<compile_context>
chip_gen: v7x
topology: tpu7x:2x2x1
jax: 0.10.0
libtpu: 0.0.40
codegen_flags: <defaults>
</compile_context>

<pallas_src>
import jax
import jax.numpy as jnp
from jax.experimental import pallas as pl
from jax.experimental.pallas import tpu as pltpu


def _outconv_kernel(wt_ref, b_ref, x_ref, o_ref):
    # wt_ref: (Cout, Cin)      b_ref: (Cout, 1) f32
    # x_ref : (BN, Cin, TM)    o_ref: (BN, Cout, TM)
    w = wt_ref[...]
    b = b_ref[...]                                   # already f32
    bn = x_ref.shape[0]                              # static
    for i in range(bn):                              # small, unrolled
        acc = jnp.dot(w, x_ref[i], preferred_element_type=jnp.float32)
        o_ref[i] = (acc + b).astype(o_ref.dtype)


def _round_up(a, m):
    return (a + m - 1) // m * m


def _divisors(v):
    out = set()
    d = 1
    while d * d <= v:
        if v % d == 0:
            out.add(d)
            out.add(v // d)
        d += 1
    return sorted(out)


def _vmem_need(bn, tm, cin, cout, itemsize, sub):
    """Honest VMEM estimate: sublane-padded double-buffered I/O tiles,
    f32 accumulator/cast temp, and resident weight/bias buffers."""
    cin_p = _round_up(cin, sub)
    cout_p = _round_up(cout, sub)
    tiles = 2 * bn * (cin_p + cout_p) * tm * itemsize          # 2x-buffered in/out
    acc = bn * _round_up(cout, 8) * tm * 4                     # f32 accumulator
    wts = 2 * (_round_up(cout, 8) * _round_up(cin, 128) * itemsize
               + _round_up(cout, 8) * 128 * 4)                 # W^T + f32 bias
    return tiles + acc + wts


def _select_tiles(n, cin, cout, hw, itemsize, tm_max, tile_budget):
    """Pick (hw_pad, tm, bn, padded) so that tm | hw_pad, bn | n, VMEM fits,
    per-step bytes are large, and the grid has >= 2 steps when possible."""
    sub = {4: 8, 2: 16, 1: 32}.get(itemsize, 8)

    def need(bn, tm):
        return _vmem_need(bn, tm, cin, cout, itemsize, sub)

    def pick_tm(hw_pad):
        tm = 128
        for c in (128 * d for d in _divisors(hw_pad // 128)):
            if c <= max(tm_max, 128) and need(1, c) <= tile_budget:
                tm = c
        return tm

    if hw % 128 == 0:
        hw_pad, padded = hw, False
        tm = pick_tm(hw_pad)
    elif need(1, hw) <= tile_budget:
        # Ragged HW row fits as one full-dim tile -> no pad, no slice.
        hw_pad, padded, tm = hw, False, hw
    else:
        # Rare fallback: ragged AND too big for one tile -> pad to 128.
        hw_pad, padded = _round_up(hw, 128), True
        tm = pick_tm(hw_pad)

    # Block several batch images per grid step when a single one moves
    # too few bytes (target >= ~1 MiB per step).
    bn = 1
    if n > 1:
        step_bytes = (cin + cout) * tm * itemsize
        target = 1 << 20
        for d in _divisors(n):
            if d > 16 or need(d, tm) > tile_budget:
                break
            bn = d
            if d * step_bytes >= target:
                break

    # Megacore: make sure there are at least 2 parallel grid steps if possible.
    if (n // bn) * (hw_pad // tm) < 2:
        if tm % 256 == 0:
            tm //= 2                      # still a multiple of 128 dividing hw_pad
        elif bn >= 2 and n % max(1, bn // 2) == 0:
            bn //= 2

    return hw_pad, tm, bn, padded, need(bn, tm)


def outconv(x, weight, bias, *, tm_max=32768):
    """1x1 conv (OutConv.forward).

    x:      (N, Cin, H, W)      NCHW, matching PyTorch
    weight: (Cout, Cin, 1, 1)   PyTorch Conv2d weight layout
    bias:   (Cout,)
    returns (N, Cout, H, W)
    """
    n, cin, h, w = x.shape
    cout = weight.shape[0]
    hw = h * w
    itemsize = jnp.dtype(x.dtype).itemsize

    # Small param reshapes only (no big-tensor transposes).
    wt = weight.reshape(cout, cin).astype(x.dtype)        # (Cout, Cin), resident
    b2 = bias.reshape(cout, 1).astype(jnp.float32)        # f32 once, not per step

    # Channels on sublanes, pixels on lanes.
    x3 = x.reshape(n, cin, hw)                            # (N, Cin, HW)

    # --- generation-aware VMEM ceiling -----------------------------------
    phys_vmem = 64 * 1024 * 1024                          # conservative default (v7x)
    try:
        phys_vmem = int(pltpu.get_tpu_info().vmem_capacity_bytes)
    except Exception:
        pass
    # ~48 MiB scoped ceiling on v7x (64 MiB physical), ~96 MiB on v5e/v6e (128 MiB).
    ceiling = min(phys_vmem * 3 // 4, 100 * 1024 * 1024)
    tile_budget = max(ceiling - (8 << 20), 8 << 20)

    hw_pad, tm, bn, padded, need = _select_tiles(
        n, cin, cout, hw, itemsize, tm_max, tile_budget)

    if padded:
        # Rare fallback only (HW not a multiple of 128 and too big for one tile).
        x3 = jnp.pad(x3, ((0, 0), (0, 0), (0, hw_pad - hw)))

    grid = (n // bn, hw_pad // tm)

    vmem_limit = int(min(max(32 << 20, need + (8 << 20)), ceiling))
    if need + (1 << 20) > vmem_limit:                     # extreme channel counts
        vmem_limit = int(min(need + (2 << 20), int(phys_vmem * 0.9)))

    cost = pl.CostEstimate(
        flops=int(2 * n * hw * cin * cout),
        transcendentals=0,
        bytes_accessed=int(n * hw * (cin + cout) * itemsize
                           + cout * cin * itemsize + cout * 4),
    )

    out3 = pl.pallas_call(
        _outconv_kernel,
        out_shape=jax.ShapeDtypeStruct((n, cout, hw_pad), x.dtype),
        grid_spec=pltpu.PrefetchScalarGridSpec(
            num_scalar_prefetch=0,
            grid=grid,
            in_specs=[
                pl.BlockSpec((cout, cin), lambda nb, ib: (0, 0)),        # W^T, resident
                pl.BlockSpec((cout, 1), lambda nb, ib: (0, 0)),          # bias, resident
                pl.BlockSpec((bn, cin, tm), lambda nb, ib: (nb, 0, ib)),  # X tile
            ],
            out_specs=pl.BlockSpec((bn, cout, tm), lambda nb, ib: (nb, 0, ib)),
        ),
        compiler_params=pltpu.CompilerParams(
            dimension_semantics=("parallel", "parallel"),
            vmem_limit_bytes=vmem_limit),
        cost_estimate=cost,
    )(wt, b2, x3)

    if padded:
        out3 = out3[:, :, :hw]
    return out3.reshape(n, cout, h, w)                    # plain reshape, no transpose


def init_outconv_params(key, in_channels, out_channels, dtype=jnp.float32):
    """Deterministic init matching nn.Conv2d(in, out, kernel_size=1) shapes."""
    kw, kb = jax.random.split(key)
    fan_in = in_channels * 1 * 1
    bound = 1.0 / jnp.sqrt(fan_in)
    weight = jax.random.uniform(
        kw, (out_channels, in_channels, 1, 1), dtype, minval=-bound, maxval=bound)
    bias = jax.random.uniform(
        kb, (out_channels,), dtype, minval=-bound, maxval=bound)
    return weight, bias


if __name__ == "__main__":
    key = jax.random.PRNGKey(0)
    k_x, k_p = jax.random.split(key)

    N, CIN, COUT, H, W = 2, 4, 3, 16, 16
    x = jax.random.normal(k_x, (N, CIN, H, W), jnp.float32)
    weight, bias = init_outconv_params(k_p, CIN, COUT)

    y = outconv(x, weight, bias)
    y = jax.block_until_ready(y)

    # Reference check (pure JAX 1x1 conv semantics).
    ref = jnp.einsum("nchw,oc->nohw", x, weight.reshape(COUT, CIN)) \
        + bias.reshape(1, COUT, 1, 1)
    assert y.shape == (N, COUT, H, W)
    assert jnp.allclose(y, ref, atol=1e-5, rtol=1e-5)

    print("KERNEL_OK")
</pallas_src>

<mosaic_0001>
module attributes {stable_mosaic.version = 11 : i64} {
  func.func @_outconv_kernel(%arg0: i32, %arg1: i32, %arg2: memref<3x4xf32, #tpu.memory_space<vmem>>, %arg3: memref<3x1xf32, #tpu.memory_space<vmem>>, %arg4: memref<2x4x128xf32, #tpu.memory_space<vmem>>, %arg5: memref<2x3x128xf32, #tpu.memory_space<vmem>>) attributes {dimension_semantics = [#tpu.dimension_semantics<parallel>, #tpu.dimension_semantics<parallel>], iteration_bounds = array<i64: 1, 2>, scalar_prefetch = 0 : i64, scratch_operands = 0 : i64, tpu.core_type = #tpu.core_type<tc>, window_params = [{pipeline_mode = #tpu.pipeline_mode<synchronous>, transform_indices = @transform_0, window_bounds = array<i64: 3, 4>}, {pipeline_mode = #tpu.pipeline_mode<synchronous>, transform_indices = @transform_1, window_bounds = array<i64: 3, 1>}, {transform_indices = @transform_2, window_bounds = array<i64: 2, 4, 128>}, {transform_indices = @transform_3, window_bounds = array<i64: 2, 3, 128>}]} {
    %c0 = arith.constant 0 : index
    %c0_0 = arith.constant 0 : index
    %0 = vector.load %arg2[%c0, %c0_0] : memref<3x4xf32, #tpu.memory_space<vmem>>, vector<3x4xf32>
    %c0_1 = arith.constant 0 : index
    %c0_2 = arith.constant 0 : index
    %1 = vector.load %arg3[%c0_1, %c0_2] : memref<3x1xf32, #tpu.memory_space<vmem>>, vector<3x1xf32>
    %c0_3 = arith.constant 0 : index
    %c0_4 = arith.constant 0 : index
    %c0_5 = arith.constant 0 : index
    %2 = vector.load %arg4[%c0_3, %c0_4, %c0_5] : memref<2x4x128xf32, #tpu.memory_space<vmem>>, vector<1x4x128xf32>
    %3 = vector.shape_cast %2 : vector<1x4x128xf32> to vector<4x128xf32>
    %cst = arith.constant dense<0.000000e+00> : vector<3x128xf32>
    %4 = tpu.matmul %0, %3, %cst {dimension_numbers = #tpu.dot_dimension_numbers<[1], [0], [0], [1], [0, 0, 1, 1], [], []>} : vector<3x4xf32>, vector<4x128xf32>, vector<3x128xf32> -> vector<3x128xf32>
    %5 = vector.broadcast %1 : vector<3x1xf32> to vector<3x128xf32>
    %6 = arith.addf %4, %5 : vector<3x128xf32>
    %c0_6 = arith.constant 0 : index
    %c0_7 = arith.constant 0 : index
    %c0_8 = arith.constant 0 : index
    %7 = vector.load %arg5[%c0_6, %c0_7, %c0_8] : memref<2x3x128xf32, #tpu.memory_space<vmem>>, vector<1x3x128xf32>
    %8 = vector.shape_cast %7 : vector<1x3x128xf32> to vector<3x128xf32>
    %9 = vector.shape_cast %6 : vector<3x128xf32> to vector<1x3x128xf32>
    tpu.vector_store %arg5[%c0_6, %c0_7, %c0_8], %9 {strides = array<i32>} : memref<2x3x128xf32, #tpu.memory_space<vmem>>, vector<1x3x128xf32>,
    %c1 = arith.constant 1 : index
    %c0_9 = arith.constant 0 : index
    %c0_10 = arith.constant 0 : index
    %10 = vector.load %arg4[%c1, %c0_9, %c0_10] : memref<2x4x128xf32, #tpu.memory_space<vmem>>, vector<1x4x128xf32>
    %11 = vector.shape_cast %10 : vector<1x4x128xf32> to vector<4x128xf32>
    %cst_11 = arith.constant dense<0.000000e+00> : vector<3x128xf32>
    %12 = tpu.matmul %0, %11, %cst_11 {dimension_numbers = #tpu.dot_dimension_numbers<[1], [0], [0], [1], [0, 0, 1, 1], [], []>} : vector<3x4xf32>, vector<4x128xf32>, vector<3x128xf32> -> vector<3x128xf32>
    %13 = vector.broadcast %1 : vector<3x1xf32> to vector<3x128xf32>
    %14 = arith.addf %12, %13 : vector<3x128xf32>
    %c1_12 = arith.constant 1 : index
    %c0_13 = arith.constant 0 : index
    %c0_14 = arith.constant 0 : index
    %15 = vector.load %arg5[%c1_12, %c0_13, %c0_14] : memref<2x3x128xf32, #tpu.memory_space<vmem>>, vector<1x3x128xf32>
    %16 = vector.shape_cast %15 : vector<1x3x128xf32> to vector<3x128xf32>
    %17 = vector.shape_cast %14 : vector<3x128xf32> to vector<1x3x128xf32>
    tpu.vector_store %arg5[%c1_12, %c0_13, %c0_14], %17 {strides = array<i32>} : memref<2x3x128xf32, #tpu.memory_space<vmem>>, vector<1x3x128xf32>,
    return
  }
  func.func @transform_0(%arg0: i32, %arg1: i32) -> (i32, i32) {
    %c0_i32 = arith.constant 0 : i32
    %c0_i32_0 = arith.constant 0 : i32
    %c0_i32_1 = arith.constant 0 : i32
    return %c0_i32, %c0_i32_0 : i32, i32
  }
  func.func @transform_1(%arg0: i32, %arg1: i32) -> (i32, i32) {
    %c0_i32 = arith.constant 0 : i32
    %c0_i32_0 = arith.constant 0 : i32
    %c0_i32_1 = arith.constant 0 : i32
    return %c0_i32, %c0_i32_0 : i32, i32
  }
  func.func @transform_2(%arg0: i32, %arg1: i32) -> (i32, i32, i32) {
    %c0_i32 = arith.constant 0 : i32
    %c0_i32_0 = arith.constant 0 : i32
    return %arg0, %c0_i32, %arg1 : i32, i32, i32
  }
  func.func @transform_3(%arg0: i32, %arg1: i32) -> (i32, i32, i32) {
    %c0_i32 = arith.constant 0 : i32
    %c0_i32_0 = arith.constant 0 : i32
    return %arg0, %c0_i32, %arg1 : i32, i32, i32
  }
}

</mosaic_0001>

<bundles_post_ra>
// kernel: tpu_custom_call.1
= control target key start
LH: loop header
LB: loop body
LE: loop exit
PB: predicated region body
PF: predicated region fallthrough
CT: control target
= control target key end

     0   :  { %8 = vsyncpa [#allocation3], 0  ;;  %s843_s0 = inlined_call_operand.vmem [shape: f32[3,4], index: 0, kind: input, shape index: {}]   ;;  %s844_s1 = inlined_call_operand.vmem [shape: f32[3,1], index: 1, kind: input, shape index: {}]   ;;  %s845_s2 = inlined_call_operand.hbm [shape: f32[2,4,256], index: 2, kind: input, shape index: {}]   ;;  %s846_s3 = inlined_call_operand.vmem [shape: f32[2,3,256], index: 3, kind: output, shape index: {}]  }
   0x1   :  { %10 = vsyncpa [#allocation3 + $0x1], 0  ;;  %s702_s12 = smov 0   ;;  %s704_s13 = smov 0  }
   0x2   :  { %s706_s14 = smov 0   ;;  %s708_s15 = smov 0  }
   0x3   :  { %s710_s16 = smov 0   ;;  %s712_s17 = smov 0  }
   0x4 LB: > { %s498_s18 = sadd.s32 4294967295, %s673_s17   ;;  %s25_s19 = sadd.s32 1, %s669_s16  ;;  %s673_s17 = sphi %s712_s17, %s16_s17   ;;  %s669_s16 = sphi %s710_s16, %s857_s16   ;;  %s665_s15 = sphi %s708_s15, %s856_s15   ;;  %s661_s14 = sphi %s706_s14, %s855_s14   ;;  %s657_s13 = sphi %s704_s13, %s854_s13   ;;  %s653_s12 = sphi %s702_s12, %s853_s12  }
   0x5   : > { %p26_p0 = scmp.ge.s32.totalorder %s25_s19, 2  ;;  %s79_s20 = sadd.s32 1, %s661_s14 }
   0x6   : > { %p86_p1 = scmp.ne.s32.totalorder %s661_s14, %s657_s13  ;;  %p87_p2 = scmp.eq.s32.totalorder %s673_s17, 0 }
   0x7   : > { %s859_s19 = smov (%p26_p0, %s25_s19), 0  ;;  %p92_p4 = scmp.ne.s32.totalorder %s657_s13, %s653_s12 }
   0x8   : > { %p738_p3 = por %p87_p2, %p86_p1  ;;  %s75_s22 = ssub.s32 %s669_s16, %s859_s19 }
   0x9   : > { %p93_p5 = scmp.eq.s32.totalorder %s498_s18, 0  ;;  %p77_p6 = scmp.eq.s32.totalorder %s75_s22, 0 }
   0xa   : > { %p118_p7 = scmp.eq.s32.totalorder %s498_s18, 1  ;;  %p537_p10 = scmp.lt.s32.totalorder %s673_s17, 2 }
   0xb   : > { %p745_p8 = por %p93_p5, %p92_p4  ;;  %s150_s26 = sand.u32 1, %s661_s14  }
   0xc   : > { %s750_s24 = scalar_select %p77_p6, %s661_s14, %s79_s20  }
   0xd   : > { %p752_p9 = por %p118_p7, %p86_p1  ;;  %s503_s27 = sshll.u32 %s669_s16, 6 }
   0xe   : > { %s502_s28 = sshll.u32 %s150_s26, 3  ;;  %s762_s4 = scalar_lea.hbm %s845_s2, %s503_s27 }
   0xf   : > { %s849_s25 = scalar_select %p752_p9, 1, 0 }
  0x10   : > { %s154_s5 = scalar_lea.vmem [#allocation2], %s502_s28  ;;  %p766_p11 = pnand %p537_p10, %p738_p3 }
  0x11   : > { %s163_s6 = sshll.u32 %s154_s5, 4  ;;  %s773_s8 = scalar_lea.sflag [#allocation3], %s150_s26  ;;  %s770_s6 = int_to_ptr.vmem [resolvable:$true] %s163_s6 }
  0x12   : > { %s593_s9 = scalar_lea.hbm %s762_s4, 128  ;;  %p595_p0 = pneg %p766_p11 }
  0x13   : > { %p594_p13 = scmp.ne.s32.totalorder %s762_s4, %s593_s9  ;;  %s598_s12 = scalar_lea.hbm %s845_s2, 256 }
  0x14   : > { %p599_p3 = scmp.lt.u32.totalorder %s762_s4, %s845_s2  ;;  %p600_p4 = scmp.lt.u32.totalorder %s598_s12, %s593_s9 }
  0x15   : > { %p596_p1 = pnand %p595_p0, %p594_p13  ;;  %p602_p6 = scmp.lt.u32.totalorder %s593_s9, %s762_s4 }
  0x16   : > { %p601_p5 = por %p600_p4, %p599_p3 }
  0x17   : > { %p597_p2 = pneg %p596_p1 }
  0x18   : > { %p603_p7 = por %p602_p6, %p601_p5 }
  0x1a   : > { %p604_p10 = pnand %p603_p7, %p597_p2 }
  0x1c   : > { %607 = shalt.err (!%p604_p10)
}
  0x1d   : > { %s608_s21 = scalar_lea.vmem %s770_s6, 128  ;;  %s675_s22 = smov [#allocation2]  }
  0x1e   : > { %p609_p13 = scmp.ne.s32.totalorder %s770_s6, %s608_s21  ;;  %s613_s26 = sshll.u32 %s675_s22, 4  ;;  %s614_s26 = int_to_ptr.vmem [resolvable:$false] %s613_s26 }
  0x1f   : > { %s615_s27 = scalar_lea.vmem %s614_s26, 256  ;;  %p616_p9 = scmp.lt.s32.totalorder %s770_s6, %s614_s26 }
  0x20   : > { %p611_p1 = pnand %p609_p13, %p595_p0  ;;  %p617_p3 = scmp.lt.s32.totalorder %s615_s27, %s608_s21 }
  0x22   : > { %p612_p12 = pneg %p611_p1  ;;  %p618_p4 = por %p617_p3, %p616_p9 }
  0x24   : > { %p619_p5 = pnand %p618_p4, %p612_p12 }
  0x26   : > { %622 = shalt.err (!%p619_p5)
}
  0x27   : > { %s676_s28 = smov 128   ;;  %s677_s29 = smov 64  }
  0x28   : > { %s678_s30 = smov 4   ;;  %p171_p0 = scmp.lt.s32.totalorder %s673_s17, 3 }
  0x29   : > { %536 = dma.hbm_to_vmem [thread:$0]  (!%p766_p11), %s762_s4, 128, %s770_s6, %s773_s8, %s676_s28, %s677_s29, %s678_s30  }
  0x2a   : > { %p851_p2 = scmp.ge.s32.totalorder %s673_s17, 1 }
  0x2c   : > { %p172_p6 = pnand %p851_p2, %p171_p0 }
  0x2d   : > { %s177_s5 = sand.u32 (!%p172_p6), 1, %s657_s13  }
  0x2e   : > { %175 = sbr.rel (%p172_p6) target bundleno = 282 (0x11a), region = 32  ;;  %s805_s9 = sshll.u32 (!%p172_p6), %s177_s5, 3 }
  0x2f   : > { %s178_s10 = scalar_lea.sflag (!%p172_p6), [#allocation3], %s177_s5  ;;  %s181_s11 = scalar_lea.vmem (!%p172_p6), [#allocation2], %s805_s9 }
  0x35   : > { %648 = dma.done.wait (%p745_p8), %s178_s10, 128  }
  0x36   : > { %650 = vsyncadd (%p745_p8), %s178_s10, 4294967168  ;;  %v679_v0 = vmov 0.0   ;;  %vm680_vm0 = vmmov 0   ;;  %v681_v1 = vmov 0   ;;  %vm217_vm1 = vcmask 1043456   ;;  %s202_s8 = scalar_lea.vmem [#allocation4], %s805_s9 }
  0x37   : > { %521 = vmatprep.subr.mxu0 %v679_v0  ;;  %526 = vmatprep.subr.mxu1 %v679_v0  ;;  %vm213_vm2 = vcmask 31744   ;;  %v207_v2 = vld [vmem:[%s181_s11] sm:$0xf]  ;;  %v509_v3 = vld [vmem:[%s181_s11 + $0x4] sm:$0xf]  ;;  %p852_p8 = scmp.ne.s32.totalorder %s849_s25, 0 }
  0x38   : > { %523 = vmatprep.mubr.msk.f32.mxu0 %vm680_vm0, %v679_v0  ;;  %528 = vmatprep.mubr.msk.f32.mxu1 %vm680_vm0, %v679_v0  ;;  %v205_v4 = vld [vmem:[%s843_s0] sm:$0x7]  ;;  %s514_s12 = sshll.u32 (%p852_p8), %s665_s15, 2 }
  0x39   : > { %592 = vset.pattern.permute.xlu0 %v681_v1  ;;  %522 = vmatpush3.msk.msra.mxu0 %vm217_vm1, %v207_v2  ;;  %v206_v5 = vld [vmem:[%s844_s1] sm:$0x7]  ;;  %s380_s21 = scalar_lea.vmem (%p852_p8), %s846_s3, %s514_s12 }
  0x3a   : > { %527 = vmatpush3.msk.msra.mxu1 %vm217_vm1, %v509_v3  ;;  %524 = vmatmul.mubr.msk.f32.vlgmr.msra.gmra.mrb[0].mxu0 %vm213_vm2, %v205_v4 }
  0x3b   : > { %529 = vmatmul.mubr.msk.f32.vlgmr.msra.gmra.mrb[0].mxu1 %vm213_vm2, %v205_v4  ;;  %210 = vperm.xlu0 %592, %v206_v5  }
  0xba   : > { %v211_v6 = vpop.permute.xlu0 %210 }
 0x10b   : > { %375 = sbr.rel (!%p852_p8) target bundleno = 282 (0x11a), region = 40 }
 0x10d   : > { %v287_v7 = vpop.f32.mrb[0].mxu0 }
 0x10e   : > { %v363_v8 = vpop.f32.mrb[0].mxu1  ;;  %v288_v9 = vadd.f32 %v287_v7, %v211_v6  ;;  %v525_v11 = vpop.f32.mrb[1].mxu0 }
 0x10f   : > { %v364_v10 = vadd.f32 %v363_v8, %v211_v6  ;;  %v530_v12 = vpop.f32.mrb[1].mxu1 }
 0x110   : > { %291 = vst [vmem:[%s202_s8] sm:$0x7] %v288_v9 }
 0x111   : > { %512 = vst [vmem:[%s202_s8 + $0x4] sm:$0x7] %v364_v10 }
 0x117   : > { %v396_v13 = vld [vmem:[%s202_s8] sm:$0xf] }
 0x118   : > { %v398_v14 = vld [vmem:[%s202_s8 + $0x4] sm:$0xf]  ;;  %397 = vst [vmem:[%s380_s21] sm:$0xf] %v396_v13 }
 0x119   : > { %399 = vst [vmem:[%s380_s21 + $0x8] sm:$0xf] %v398_v14 }
 0x11a PF: > { %s16_s17 = sadd.s32 1, %s673_s17   ;;  %s853_s12 = smov %s657_s13 }
 0x11b   : > { %p13_p9 = scmp.ge.s32.totalorder %s16_s17, 4   ;;  %s854_s13 = smov %s661_s14 }
 0x11c   : > { %s855_s14 = smov %s750_s24  ;;  %s856_s15 = smov %s669_s16 }
 0x11d   : > { %s857_s16 = smov %s859_s19  ;;  %15 = sbr.rel (!%p13_p9) target bundleno = 4 (0x4), region = 115 }
 0x124   :  { %436 = vsyncpa [#allocation3], 1 }
 0x125   :  { %438 = vsyncpa [#allocation3 + $0x1], 1 }

</bundles_post_ra>
